<compile_context>
chip_gen: v6e
topology: v6e:2x2x1
jax: 0.10.0
libtpu: 0.0.40
codegen_flags: <defaults>
</compile_context>

<pallas_src>
import jax
import jax.numpy as jnp
import numpy as np
from jax.experimental import pallas as pl
from jax.experimental.pallas import tpu as pltpu  # noqa: F401  (TPU backend; no TPU-specific params needed at this size)

IN_FEATS = 32
OUT_FEATS = 32          # must equal IN_FEATS for this module's forward to type-check
NUM_HEADS = 4
N_SENT = 16
N_PAIR = 12

LANES = 128             # lane-dense slab width


def _round_up(x, m):
    return (x + m - 1) // m * m


def _pad2(x, rows, cols):
    """Zero-pad a 2-D array up to (rows, cols)."""
    return jnp.pad(x, ((0, rows - x.shape[0]), (0, cols - x.shape[1])))


# ----------------------------------------------------------------------------
# Fused Pallas kernel: single step, both edge types stacked along sublanes.
#   ft_ref    (R, 128): dst-node features per edge type, zero-padded
#   maskT_ref (R, 128): A^T per edge type (row = dst node, lanes = src nodes)
#   bias_ref  (R, 128): head-mean bias broadcast to the *valid* dst rows only
#   out_ref   (R, 128): out = ft * 1{in_degree>0} + bias
# ----------------------------------------------------------------------------
def _ep_gat_fused_kernel(ft_ref, maskT_ref, bias_ref, out_ref):
    # edge-softmax weights sum to exactly 1 per (dst, head) row (0 if no
    # incoming edge), and v_mul_e uses the dst feature -> in-degree indicator.
    deg = jnp.sum(maskT_ref[...], axis=-1, keepdims=True)           # (R, 1)
    s = (deg > jnp.float32(0.0)).astype(jnp.float32)                # 1{deg>0}
    out_ref[...] = ft_ref[...] * s + bias_ref[...]


# ----------------------------------------------------------------------------
# Module forward (mirrors EP_GAT_PS.forward)
# ----------------------------------------------------------------------------
def ep_gat_ps_forward(mparams, adj, feats, *, num_heads, out_feats):
    H, D = num_heads, out_feats
    rel_sp, h_sent_sp, h_pair_sp = feats[('sent', 'sp', 'pair')]
    rel_ps, h_pair_ps, h_sent_ps = feats[('pair', 'ps', 'sent')]

    # Per-edge-type (dst 'ft' feature, adjacency A[src, dst], dst-type bias):
    #   edge type 0: 'sp' (src=sent, dst=pair) -> ft = h_pair, bias_pair
    #   edge type 1: 'ps' (src=pair, dst=sent) -> ft = h_sent, bias_sent
    # fc_src / fc_dst / attn_l / attn_r drop out of the forward exactly (see
    # header comment), so they are not fed to the kernel.
    etypes = [
        (jnp.asarray(h_pair_sp, jnp.float32),
         jnp.asarray(adj['sp'], jnp.float32),
         jnp.asarray(mparams['bias_pair'], jnp.float32)),
        (jnp.asarray(h_sent_ps, jnp.float32),
         jnp.asarray(adj['ps'], jnp.float32),
         jnp.asarray(mparams['bias_sent'], jnp.float32)),
    ]
    n_dst = [ft.shape[0] for ft, _, _ in etypes]
    nd_pad = _round_up(max(n_dst), 8)
    rows = 2 * nd_pad
    W = LANES

    ft_blocks, mask_blocks, bias_blocks = [], [], []
    for ft, A, bias in etypes:
        nd = ft.shape[0]
        ft_blocks.append(_pad2(ft, nd_pad, W))
        mask_blocks.append(_pad2(A.T, nd_pad, W))                 # (nd, ns) padded
        bias_mean = bias.reshape(H, D).mean(axis=0)               # head-mean (D,)
        # Broadcast only to valid rows so padded rows come out exactly zero.
        bias_blocks.append(
            _pad2(jnp.broadcast_to(bias_mean[None, :], (nd, D)), nd_pad, W))

    ft_slab = jnp.concatenate(ft_blocks, axis=0)      # (rows, 128)
    mask_slab = jnp.concatenate(mask_blocks, axis=0)  # (rows, 128)
    bias_slab = jnp.concatenate(bias_blocks, axis=0)  # (rows, 128)

    out = pl.pallas_call(
        _ep_gat_fused_kernel,
        grid=(1,),
        in_specs=[pl.BlockSpec((rows, W), lambda i: (0, 0))] * 3,
        out_specs=pl.BlockSpec((rows, W), lambda i: (0, 0)),
        out_shape=jax.ShapeDtypeStruct((rows, W), jnp.float32),
    )(ft_slab, mask_slab, bias_slab)

    h_pair_tmp = out[0:n_dst[0], :D]                  # etype 'sp' -> pair nodes
    h_sent_tmp = out[nd_pad:nd_pad + n_dst[1], :D]    # etype 'ps' -> sent nodes
    return h_pair_tmp, h_sent_tmp


# ----------------------------------------------------------------------------
# Pure-JAX reference (literal, unfolded math) for a correctness check
# ----------------------------------------------------------------------------
def _etype_ref(h_src, h_dst, ft_dst, A, w_src, w_dst, attn_l, attn_r, bias,
               num_heads, out_feats):
    H, D = num_heads, out_feats
    feat_src = (h_src @ w_src.T).reshape(-1, H, D)
    feat_dst = (h_dst @ w_dst.T).reshape(-1, H, D)
    el = jnp.sum(feat_src * attn_l.reshape(1, H, D), axis=-1)     # (Ns, H)
    er = jnp.sum(feat_dst * attn_r.reshape(1, H, D), axis=-1)     # (Nd, H)
    e = el[:, None, :] * er[None, :, :]                           # (Ns, Nd, H)
    mask = (A > 0)[:, :, None]
    masked = jnp.where(mask, e, -jnp.inf)
    m = jnp.max(masked, axis=0, keepdims=True)
    m = jnp.where(jnp.isfinite(m), m, 0.0)
    p = jnp.where(mask, jnp.exp(masked - m), 0.0)
    denom = jnp.sum(p, axis=0, keepdims=True)
    a = jnp.where(denom > 0, p / jnp.maximum(denom, 1e-30), 0.0)
    attn_sum = jnp.sum(a, axis=0)                                 # (Nd, H)
    ft_tmp = ft_dst[:, None, :] * attn_sum[:, :, None]            # (Nd, H, D)
    return (ft_tmp + bias.reshape(1, H, D)).mean(axis=1)


def reference_forward(mparams, adj, feats, *, num_heads, out_feats):
    rel_sp, h_sent_sp, h_pair_sp = feats[('sent', 'sp', 'pair')]
    h_pair_tmp = _etype_ref(h_sent_sp, rel_sp, h_pair_sp, adj['sp'],
                            mparams['fc_src_w'], mparams['fc_dst_w'],
                            mparams['attn_l_sp'], mparams['attn_r_sp'],
                            mparams['bias_pair'], num_heads, out_feats)
    rel_ps, h_pair_ps, h_sent_ps = feats[('pair', 'ps', 'sent')]
    h_sent_tmp = _etype_ref(rel_ps, h_sent_ps, h_sent_ps, adj['ps'],
                            mparams['fc_src_w'], mparams['fc_dst_w'],
                            mparams['attn_l_ps'], mparams['attn_r_ps'],
                            mparams['bias_sent'], num_heads, out_feats)
    return h_pair_tmp, h_sent_tmp


# ----------------------------------------------------------------------------
if __name__ == "__main__":
    H, D = NUM_HEADS, OUT_FEATS
    HD = H * D
    gain = float(np.sqrt(2.0))  # nn.init.calculate_gain('relu')

    key = jax.random.PRNGKey(0)
    ks = jax.random.split(key, 12)

    def xavier(k, shape, fan_in, fan_out):
        std = gain * np.sqrt(2.0 / (fan_in + fan_out))
        return std * jax.random.normal(k, shape, jnp.float32)

    mparams = {
        'fc_src_w': xavier(ks[0], (HD, IN_FEATS), IN_FEATS, HD),
        'fc_dst_w': xavier(ks[1], (HD, OUT_FEATS), OUT_FEATS, HD),
        'attn_l_ps': xavier(ks[2], (1, H, D), D, D),
        'attn_r_ps': xavier(ks[3], (1, H, D), D, D),
        'attn_l_sp': xavier(ks[4], (1, H, D), D, D),
        'attn_r_sp': xavier(ks[5], (1, H, D), D, D),
        'bias_sent': jnp.zeros((HD,), jnp.float32),   # init.constant_(..., 0)
        'bias_pair': jnp.zeros((HD,), jnp.float32),
    }

    h_sent = jax.random.normal(ks[6], (N_SENT, IN_FEATS), jnp.float32)
    h_pair = jax.random.normal(ks[7], (N_PAIR, OUT_FEATS), jnp.float32)
    rel_sp = jax.random.normal(ks[8], (N_PAIR, OUT_FEATS), jnp.float32)
    rel_ps = jax.random.normal(ks[9], (N_PAIR, IN_FEATS), jnp.float32)

    # dense adjacency: adj[src, dst] == 1 iff edge src->dst exists
    adj = {
        'sp': (jax.random.uniform(ks[10], (N_SENT, N_PAIR)) < 0.6).astype(jnp.float32),
        'ps': (jax.random.uniform(ks[11], (N_PAIR, N_SENT)) < 0.6).astype(jnp.float32),
    }

    feats = {
        ('sent', 'sp', 'pair'): (rel_sp, h_sent, h_pair),
        ('pair', 'ps', 'sent'): (rel_ps, h_pair, h_sent),
    }

    h_pair_out, h_sent_out = ep_gat_ps_forward(
        mparams, adj, feats, num_heads=H, out_feats=D)
    jax.block_until_ready((h_pair_out, h_sent_out))

    ref_pair, ref_sent = reference_forward(
        mparams, adj, feats, num_heads=H, out_feats=D)
    # Kernel uses the exact attn_sum==1 identity; reference computes the full
    # softmax numerically, so agreement is to float rounding only.
    np.testing.assert_allclose(np.asarray(h_pair_out), np.asarray(ref_pair),
                               rtol=1e-5, atol=1e-5)
    np.testing.assert_allclose(np.asarray(h_sent_out), np.asarray(ref_sent),
                               rtol=1e-5, atol=1e-5)

    print("KERNEL_OK")
</pallas_src>

<mosaic_0001>
module attributes {stable_mosaic.version = 11 : i64} {
  func.func @_ep_gat_fused_kernel(%arg0: i32, %arg1: memref<32x128xf32, #tpu.memory_space<vmem>>, %arg2: memref<32x128xf32, #tpu.memory_space<vmem>>, %arg3: memref<32x128xf32, #tpu.memory_space<vmem>>, %arg4: memref<32x128xf32, #tpu.memory_space<vmem>>) attributes {dimension_semantics = [#tpu.dimension_semantics<arbitrary>], iteration_bounds = array<i64: 1>, scalar_prefetch = 0 : i64, scratch_operands = 0 : i64, tpu.core_type = #tpu.core_type<tc>, window_params = [{pipeline_mode = #tpu.pipeline_mode<synchronous>, transform_indices = @transform_0, window_bounds = array<i64: 32, 128>}, {pipeline_mode = #tpu.pipeline_mode<synchronous>, transform_indices = @transform_1, window_bounds = array<i64: 32, 128>}, {pipeline_mode = #tpu.pipeline_mode<synchronous>, transform_indices = @transform_2, window_bounds = array<i64: 32, 128>}, {pipeline_mode = #tpu.pipeline_mode<synchronous>, transform_indices = @transform_3, window_bounds = array<i64: 32, 128>}]} {
    %c0 = arith.constant 0 : index
    %c0_0 = arith.constant 0 : index
    %0 = vector.load %arg2[%c0, %c0_0] : memref<32x128xf32, #tpu.memory_space<vmem>>, vector<32x128xf32>
    %cst = arith.constant dense<0.000000e+00> : vector<32xf32>
    %1 = vector.multi_reduction <add>, %0, %cst [1] : vector<32x128xf32> to vector<32xf32>
    %2 = vector.shape_cast %1 : vector<32xf32> to vector<32x1xf32>
    %cst_1 = arith.constant 0.000000e+00 : f32
    %3 = vector.broadcast %cst_1 : f32 to vector<32x1xf32>
    %4 = arith.cmpf ogt, %2, %3 : vector<32x1xf32>
    %5 = arith.extui %4 : vector<32x1xi1> to vector<32x1xi32>
    %6 = arith.sitofp %5 : vector<32x1xi32> to vector<32x1xf32>
    %c0_2 = arith.constant 0 : index
    %c0_3 = arith.constant 0 : index
    %7 = vector.load %arg1[%c0_2, %c0_3] : memref<32x128xf32, #tpu.memory_space<vmem>>, vector<32x128xf32>
    %8 = vector.broadcast %6 : vector<32x1xf32> to vector<32x128xf32>
    %9 = arith.mulf %7, %8 : vector<32x128xf32>
    %c0_4 = arith.constant 0 : index
    %c0_5 = arith.constant 0 : index
    %10 = vector.load %arg3[%c0_4, %c0_5] : memref<32x128xf32, #tpu.memory_space<vmem>>, vector<32x128xf32>
    %11 = arith.addf %9, %10 : vector<32x128xf32>
    %c0_6 = arith.constant 0 : index
    %c0_7 = arith.constant 0 : index
    %12 = vector.load %arg4[%c0_6, %c0_7] : memref<32x128xf32, #tpu.memory_space<vmem>>, vector<32x128xf32>
    tpu.vector_store %arg4[%c0_6, %c0_7], %11 {strides = array<i32>} : memref<32x128xf32, #tpu.memory_space<vmem>>, vector<32x128xf32>,
    return
  }
  func.func @transform_0(%arg0: i32) -> (i32, i32) {
    %c0_i32 = arith.constant 0 : i32
    %c0_i32_0 = arith.constant 0 : i32
    %c0_i32_1 = arith.constant 0 : i32
    return %c0_i32, %c0_i32_0 : i32, i32
  }
  func.func @transform_1(%arg0: i32) -> (i32, i32) {
    %c0_i32 = arith.constant 0 : i32
    %c0_i32_0 = arith.constant 0 : i32
    %c0_i32_1 = arith.constant 0 : i32
    return %c0_i32, %c0_i32_0 : i32, i32
  }
  func.func @transform_2(%arg0: i32) -> (i32, i32) {
    %c0_i32 = arith.constant 0 : i32
    %c0_i32_0 = arith.constant 0 : i32
    %c0_i32_1 = arith.constant 0 : i32
    return %c0_i32, %c0_i32_0 : i32, i32
  }
  func.func @transform_3(%arg0: i32) -> (i32, i32) {
    %c0_i32 = arith.constant 0 : i32
    %c0_i32_0 = arith.constant 0 : i32
    %c0_i32_1 = arith.constant 0 : i32
    return %c0_i32, %c0_i32_0 : i32, i32
  }
}

</mosaic_0001>

<bundles_post_ra>
// kernel: tpu_custom_call.1
= control target key start
LH: loop header
LB: loop body
LE: loop exit
PB: predicated region body
PF: predicated region fallthrough
CT: control target
= control target key end

     0   :  { %8 = vsyncpa [#allocation3], 0  ;;  %s266_s0 = inlined_call_operand.hbm [shape: f32[32,128], index: 0, kind: input, shape index: {}]   ;;  %s267_s1 = inlined_call_operand.hbm [shape: f32[32,128], index: 1, kind: input, shape index: {}]   ;;  %s268_s2 = inlined_call_operand.hbm [shape: f32[32,128], index: 2, kind: input, shape index: {}]   ;;  %s269_s3 = inlined_call_operand.hbm [shape: f32[32,128], index: 3, kind: output, shape index: {}]  }
   0x1   :  { %9 = vsyncpa [#allocation6], 0 }
   0x2   :  { %10 = vsyncpa [#allocation4], 0  ;;  %s215_s12 = smov [#allocation5]   ;;  %s216_s14 = smov [#allocation2]  }
   0x3   :  { %s28_s13 = sshll.u32 %s215_s12, 4  ;;  %s16_s15 = sshll.u32 %s216_s14, 4  ;;  %s29_s13 = int_to_ptr.vmem [resolvable:$true] %s28_s13  ;;  %s17_s15 = int_to_ptr.vmem [resolvable:$true] %s16_s15 }
   0x4   :  { %s137_s16 = scalar_lea.vmem %s29_s13, 512  ;;  %p142_p1 = scmp.lt.s32.totalorder %s29_s13, %s29_s13 }
   0x5   :  { %p138_p0 = scmp.ne.s32.totalorder %s29_s13, %s137_s16  ;;  %p143_p2 = scmp.lt.s32.totalorder %s137_s16, %s137_s16 }
   0x7   :  { %p144_p3 = por %p143_p2, %p142_p1 }
   0x9   :  { %p145_p4 = pnand %p144_p3, %p138_p0 }
   0xb   :  { %148 = shalt.err (!%p145_p4)
}
   0xc   :  { %s217_s17 = smov 128   ;;  %s218_s18 = smov 8  }
   0xd   :  { %34 = dma.hbm_to_vmem [thread:$0]  %s267_s1, 512, %s29_s13, [#allocation6], %s217_s17, %s217_s17, %s218_s18  }
   0xe   :  { %s157_s21 = scalar_lea.vmem %s17_s15, 512  ;;  %p162_p6 = scmp.lt.s32.totalorder %s17_s15, %s17_s15 }
   0xf   :  { %p158_p5 = scmp.ne.s32.totalorder %s17_s15, %s157_s21  ;;  %p163_p7 = scmp.lt.s32.totalorder %s157_s21, %s157_s21 }
  0x11   :  { %p164_p8 = por %p163_p7, %p162_p6 }
  0x13   :  { %p165_p9 = pnand %p164_p8, %p158_p5 }
  0x15   :  { %168 = shalt.err (!%p165_p9)
}
  0x16   :  { %22 = dma.hbm_to_vmem [thread:$0]  %s266_s0, 512, %s17_s15, [#allocation3], %s217_s17, %s217_s17, %s218_s18  }
  0x17   :  { %s219_s24 = smov [#allocation7]  }
  0x18   :  { %s40_s25 = sshll.u32 %s219_s24, 4  ;;  %s41_s25 = int_to_ptr.vmem [resolvable:$true] %s40_s25 }
  0x19   :  { %s177_s26 = scalar_lea.vmem %s41_s25, 512  ;;  %p182_p11 = scmp.lt.s32.totalorder %s41_s25, %s41_s25 }
  0x1a   :  { %p178_p10 = scmp.ne.s32.totalorder %s41_s25, %s177_s26  ;;  %p183_p12 = scmp.lt.s32.totalorder %s177_s26, %s177_s26 }
  0x1c   :  { %p184_p13 = por %p183_p12, %p182_p11 }
  0x1e   :  { %p185_p0 = pnand %p184_p13, %p178_p10 }
  0x20   :  { %188 = shalt.err (!%p185_p0)
}
  0x21   :  { %46 = dma.hbm_to_vmem [thread:$0]  %s268_s2, 512, %s41_s25, [#allocation6], %s217_s17, %s217_s17, %s218_s18  }
  0x22   :  { %209 = dma.done.wait [#allocation3], 512  }
  0x23   :  { %210 = vsyncadd [#allocation3], 4294966784 }
  0x24   :  { %211 = dma.done.wait [#allocation6], 1024  }
  0x25   :  { %212 = vsyncadd [#allocation6], 4294966272  ;;  %v58_v0 = vld [vmem:[#allocation5 + $0x10] sm:$0xff]  ;;  %v56_v1 = vld [vmem:[#allocation5] sm:$0xff]  ;;  %v220_v9 = vmov 0.0   ;;  %s221_s0 = smov [#allocation8]  }
  0x26   :  { %64 = vadd.xlane.f32.xlu1 %v58_v0  ;;  %60 = vadd.xlane.f32.xlu0 %v56_v1  ;;  %v59_v2 = vld [vmem:[#allocation5 + $0x18] sm:$0xff]  ;;  %v57_v3 = vld [vmem:[#allocation5 + $0x8] sm:$0xff]  ;;  %v82_v4 = vld [vmem:[#allocation2 + $0x10] sm:$0xff]  ;;  %s105_s2 = sshll.u32 %s221_s0, 4  ;;  %s106_s2 = int_to_ptr.vmem [resolvable:$true] %s105_s2 }
  0x27   :  { %v80_v6 = vld [vmem:[#allocation2] sm:$0xff]  ;;  %v90_v8 = vld [vmem:[#allocation7 + $0x10] sm:$0xff]  ;;  %v83_v15 = vld [vmem:[#allocation2 + $0x18] sm:$0xff]  ;;  %s189_s28 = scalar_lea.vmem %s106_s2, 512  ;;  %p194_p2 = scmp.lt.s32.totalorder %s106_s2, %s106_s2 }
  0x28   :  { %v88_v11 = vld [vmem:[#allocation7] sm:$0xff]  ;;  %v81_v17 = vld [vmem:[#allocation2 + $0x8] sm:$0xff]  ;;  %v91_v21 = vld [vmem:[#allocation7 + $0x18] sm:$0xff]  ;;  %p190_p1 = scmp.ne.s32.totalorder %s106_s2, %s189_s28  ;;  %p195_p3 = scmp.lt.s32.totalorder %s189_s28, %s189_s28 }
  0x29   :  { %v89_v23 = vld [vmem:[#allocation7 + $0x8] sm:$0xff] }
  0x2a   :  { %66 = vadd.xlane.f32.xlu1 %v59_v2  ;;  %62 = vadd.xlane.f32.xlu0 %v57_v3  ;;  %p196_p4 = por %p195_p3, %p194_p2 }
  0x2c   :  { %p197_p5 = pnand %p196_p4, %p190_p1 }
  0xaf   :  { %v65_v5 = vpop.xlane.xlu1 %64  ;;  %v61_v7 = vpop.xlane.xlu0 %60 }
  0xb0   :  { %vm70_vm0 = vcmp.gt.f32.partialorder %v65_v5, 0.0  ;;  %vm68_vm1 = vcmp.gt.f32.partialorder %v61_v7, 0.0 }
  0xb1   :  { %v120_v10 = vsel %vm70_vm0, 1.0, %v220_v9  ;;  %v118_v12 = vsel %vm68_vm1, 1.0, %v220_v9 }
  0xb2   :  { %v86_v13 = vmul.f32 %v120_v10, %v82_v4  ;;  %v84_v14 = vmul.f32 %v118_v12, %v80_v6 }
  0xb3   :  { %v67_v16 = vpop.xlane.xlu1 %66  ;;  %v63_v18 = vpop.xlane.xlu0 %62 }
  0xb4   :  { %v94_v19 = vadd.f32 %v90_v8, %v86_v13  ;;  %v92_v20 = vadd.f32 %v88_v11, %v84_v14  ;;  %vm71_vm2 = vcmp.gt.f32.partialorder %v67_v16, 0.0  ;;  %vm69_vm3 = vcmp.gt.f32.partialorder %v63_v18, 0.0 }
  0xb5   :  { %v121_v22 = vsel %vm71_vm2, 1.0, %v220_v9  ;;  %v119_v24 = vsel %vm69_vm3, 1.0, %v220_v9 }
  0xb6   :  { %98 = vst [vmem:[#allocation8 + $0x10] sm:$0xff] %v94_v19  ;;  %96 = vst [vmem:[#allocation8] sm:$0xff] %v92_v20  ;;  %v87_v25 = vmul.f32 %v121_v22, %v83_v15  ;;  %v85_v26 = vmul.f32 %v119_v24, %v81_v17 }
  0xb8   :  { %v95_v27 = vadd.f32 %v91_v21, %v87_v25  ;;  %v93_v28 = vadd.f32 %v89_v23, %v85_v26 }
  0xba   :  { %99 = vst [vmem:[#allocation8 + $0x18] sm:$0xff] %v95_v27  ;;  %97 = vst [vmem:[#allocation8 + $0x8] sm:$0xff] %v93_v28 }
  0xbb   :  { %200 = shalt.err (!%p197_p5)
}
  0xbc   :  { %111 = dma.vmem_to_hbm [thread:$0]  %s106_s2, 512, %s269_s3, [#allocation4], %s217_s17, %s217_s17, %s218_s18  }
  0xbd   :  { %213 = dma.done.wait [#allocation4], 512  }
  0xbe   :  { %214 = vsyncadd [#allocation4], 4294966784 }
  0xbf   :  { %115 = vsyncpa [#allocation3], 1 }
  0xc0   :  { %116 = vsyncpa [#allocation6], 1 }
  0xc1   :  { %117 = vsyncpa [#allocation4], 1 }

</bundles_post_ra>
